<compile_context>
chip_gen: v5e
topology: v5e:2x2
jax: 0.10.0
libtpu: 0.0.40
codegen_flags: <defaults>
</compile_context>

<pallas_src>
import functools

import jax
import jax.numpy as jnp
from jax import lax
from jax.experimental import pallas as pl
from jax.experimental.pallas import tpu as pltpu

_MIB = 1024 * 1024


def _round_up(n, m):
    return -(-n // m) * m


# ---------------------------------------------------------------------------
# Batched dense kernel:  out = x @ W + b   (grid-parallel over tiles)
# ---------------------------------------------------------------------------
def _dense_kernel(x_ref, w_ref, b_ref, o_ref):
    o_ref[...] = (
        jnp.dot(x_ref[...], w_ref[...], preferred_element_type=jnp.float32)
        + b_ref[...]
    ).astype(o_ref.dtype)


def _pick_tile(n, cap, align):
    """Largest tile <= cap that divides n (align-multiple, unless n <= cap)."""
    if n <= cap:
        return n
    t = (cap // align) * align
    while t >= align:
        if n % t == 0:
            return t
        t -= align
    return n  # fallback: full block (always legal)


def _dense(x, w, b, *, row_cap=512, col_cap=1024):
    """x: (R, K), w: (K, N), b: (1, N) -> (R, N) f32.

    R must be a multiple of 8; callers pad N to a multiple of 128 (or N fits
    in a single column tile).  Column tiles ride the slow grid axis so the
    weight block is streamed from HBM exactly once per column tile; only the
    small activation row blocks are re-read.
    """
    R, K = x.shape
    N = w.shape[1]
    tr = _pick_tile(R, row_cap, 8)
    tn = _pick_tile(N, col_cap, 128)
    vmem_need = int(2 * (tr * K + K * tn + tn + tr * tn) * 4 + 4 * _MIB)
    return pl.pallas_call(
        _dense_kernel,
        out_shape=jax.ShapeDtypeStruct((R, N), jnp.float32),
        grid=(N // tn, R // tr),                 # col tiles slow, row tiles fast
        in_specs=[
            pl.BlockSpec((tr, K), lambda j, i: (i, 0)),
            pl.BlockSpec((K, tn), lambda j, i: (0, j)),
            pl.BlockSpec((1, tn), lambda j, i: (0, j)),
        ],
        out_specs=pl.BlockSpec((tr, tn), lambda j, i: (i, j)),
        compiler_params=pltpu.CompilerParams(
            dimension_semantics=("parallel", "parallel"),
            vmem_limit_bytes=vmem_need),
    )(x, w, b)


# ---------------------------------------------------------------------------
# Recurrent LSTM kernel: batch-tiled grid, in-kernel time loop.
#   xg_ref : (T, tb, 4Hp)  precomputed  x_t @ W_ih^T + b_ih + b_hh   (f32)
#   whh_ref: (Hp, 4Hp)     hidden->gates weight (transposed, gate-padded)
#   h_ref  : (T, tb, Hp)   output hidden states for this batch tile
# (h, c) are carried through the fori_loop; one MXU matmul per step.
# ---------------------------------------------------------------------------
def _lstm_recurrence_kernel(xg_ref, whh_ref, h_ref, *,
                            hidden_pad, seq_len, unroll):
    Hp = hidden_pad
    tb = xg_ref.shape[1]

    def step(t, carry):
        h, c = carry
        gates = xg_ref[t] + jnp.dot(h, whh_ref[...],
                                    preferred_element_type=jnp.float32)
        # PyTorch LSTM gate order: i, f, g, o  (each block lane-aligned to Hp)
        i_g = jax.nn.sigmoid(gates[:, 0 * Hp:1 * Hp])
        f_g = jax.nn.sigmoid(gates[:, 1 * Hp:2 * Hp])
        g_g = jnp.tanh(gates[:, 2 * Hp:3 * Hp])
        o_g = jax.nn.sigmoid(gates[:, 3 * Hp:4 * Hp])
        c_new = f_g * c + i_g * g_g
        h_new = o_g * jnp.tanh(c_new)
        h_ref[t] = h_new
        return (h_new, c_new)

    init = (jnp.zeros((tb, Hp), jnp.float32), jnp.zeros((tb, Hp), jnp.float32))
    lax.fori_loop(0, seq_len, step, init, unroll=unroll)


def _pick_batch_tile(Bp, T, Hp, budget_bytes):
    """Largest batch tile (mult of 8, divides Bp) whose double-buffered
    xg/h tiles + resident W_hh fit under budget_bytes (v7x-safe)."""
    whh_bytes = Hp * 4 * Hp * 4
    best = 8
    tb = 8
    while tb <= min(Bp, 512):
        if Bp % tb == 0:
            need = 2 * T * tb * (4 * Hp + Hp) * 4 + whh_bytes
            if need <= budget_bytes:
                best = tb
        tb += 8
    return best


def _pad_gate_rows(w, H, Hp):
    """Pad each of the 4 stacked gate blocks (rows) from H to Hp with zeros."""
    if Hp == H:
        return w
    pad = ((0, Hp - H),) + ((0, 0),) * (w.ndim - 1)
    return jnp.concatenate(
        [jnp.pad(w[k * H:(k + 1) * H], pad) for k in range(4)], axis=0)


# ---------------------------------------------------------------------------
# Forward wrapper = DecoderRNN.forward(features, captions)
# ---------------------------------------------------------------------------
def decoder_rnn_forward(params, features, captions):
    """features: (B, E) f32, captions: (B, Tc) int32 -> logits (B, Tc, V)."""
    embed_tbl = params["embed"]                       # (V, E)
    w_ih, w_hh = params["w_ih"], params["w_hh"]       # (4H, E), (4H, H)
    b_ih, b_hh = params["b_ih"], params["b_hh"]       # (4H,)
    w_lin, b_lin = params["w_lin"], params["b_lin"]   # (V, H), (V,)

    B, E = features.shape
    V = embed_tbl.shape[0]
    H = w_ih.shape[0] // 4
    Hp = _round_up(H, 128)                            # lane-aligned gate width
    Vp = _round_up(V, 128)                            # lane-aligned vocab

    # --- glue: time-major embeddings via gather on transposed int ids -------
    cap_ids = jnp.transpose(captions[:, :-1])                 # (T-1, B) int32
    cap_emb = jnp.take(embed_tbl, cap_ids, axis=0)            # (T-1, B, E)
    x_tm = jnp.concatenate(
        [features[None].astype(jnp.float32), cap_emb.astype(jnp.float32)],
        axis=0)                                               # (T, B, E)
    T = x_tm.shape[0]

    # pad batch to a sublane multiple so per-step vector ops / stores are full
    Bp = _round_up(B, 8)
    if Bp != B:
        x_tm = jnp.pad(x_tm, ((0, 0), (0, Bp - B), (0, 0)))

    # --- per-gate H -> Hp padding so gate slices are 128-lane aligned -------
    w_ih_p = _pad_gate_rows(w_ih, H, Hp)                              # (4Hp, E)
    w_hh_p = _pad_gate_rows(jnp.pad(w_hh, ((0, 0), (0, Hp - H))), H, Hp)  # (4Hp, Hp)
    b_p = _pad_gate_rows(b_ih + b_hh, H, Hp)                          # (4Hp,)

    wih_t = jnp.transpose(w_ih_p).astype(jnp.float32)          # (E, 4Hp)
    whh_t = jnp.transpose(w_hh_p).astype(jnp.float32)          # (Hp, 4Hp)
    b_all = b_p.reshape(1, 4 * Hp).astype(jnp.float32)         # (1, 4Hp)

    # --- batched gate-input projection (hoisted out of the recurrence) ------
    xg = _dense(x_tm.reshape(T * Bp, E), wih_t, b_all)         # (T*Bp, 4Hp)
    xg = xg.reshape(T, Bp, 4 * Hp)

    # --- serial recurrence: batch-tiled grid, in-kernel time loop -----------
    tb = _pick_batch_tile(Bp, T, Hp, budget_bytes=40 * _MIB)   # v7x-safe budget
    vmem_need = int(2 * T * tb * (4 * Hp + Hp) * 4 + Hp * 4 * Hp * 4 + 4 * _MIB)
    unroll = T if T <= 8 else 4
    h_tm = pl.pallas_call(
        functools.partial(_lstm_recurrence_kernel,
                          hidden_pad=Hp, seq_len=T, unroll=unroll),
        out_shape=jax.ShapeDtypeStruct((T, Bp, Hp), jnp.float32),
        grid=(Bp // tb,),
        in_specs=[
            pl.BlockSpec((T, tb, 4 * Hp), lambda i: (0, i, 0)),
            pl.BlockSpec((Hp, 4 * Hp), lambda i: (0, 0)),
        ],
        out_specs=pl.BlockSpec((T, tb, Hp), lambda i: (0, i, 0)),
        compiler_params=pltpu.CompilerParams(
            dimension_semantics=("parallel",),
            vmem_limit_bytes=vmem_need),
    )(xg, whh_t)

    # --- vocab projection, batched over all (B, T) rows ---------------------
    # (small (T,B,Hp)->(B,T,Hp) shuffle; big (B*T, V) logits need no transpose)
    hs = jnp.transpose(h_tm[:, :B, :], (1, 0, 2)).reshape(B * T, Hp)
    R = B * T
    Rp = _round_up(R, 8)
    if Rp != R:
        hs = jnp.pad(hs, ((0, Rp - R), (0, 0)))
    wl_t = jnp.transpose(w_lin).astype(jnp.float32)            # (H, V)
    wl_t = jnp.pad(wl_t, ((0, Hp - H), (0, Vp - V)))           # (Hp, Vp)
    bl = jnp.pad(b_lin.astype(jnp.float32), (0, Vp - V)).reshape(1, Vp)
    logits = _dense(hs, wl_t, bl)                              # (Rp, Vp)
    return logits[:R, :V].reshape(B, T, V)


# ---------------------------------------------------------------------------
# Pure-JAX reference (same math as the PyTorch module) for a sanity check.
# ---------------------------------------------------------------------------
def _reference_forward(params, features, captions):
    embed_tbl = params["embed"]
    w_ih, w_hh = params["w_ih"], params["w_hh"]
    b = params["b_ih"] + params["b_hh"]
    w_lin, b_lin = params["w_lin"], params["b_lin"]
    H = w_hh.shape[1]

    cap_emb = jnp.take(embed_tbl, captions[:, :-1], axis=0)
    x = jnp.concatenate([features[:, None, :], cap_emb], axis=1)  # (B, T, E)
    B = x.shape[0]

    def step(carry, xt):
        h, c = carry
        gates = xt @ w_ih.T + h @ w_hh.T + b
        i = jax.nn.sigmoid(gates[:, 0 * H:1 * H])
        f = jax.nn.sigmoid(gates[:, 1 * H:2 * H])
        g = jnp.tanh(gates[:, 2 * H:3 * H])
        o = jax.nn.sigmoid(gates[:, 3 * H:4 * H])
        c = f * c + i * g
        h = o * jnp.tanh(c)
        return (h, c), h

    h0 = jnp.zeros((B, H), jnp.float32)
    (_, _), hs = jax.lax.scan(step, (h0, h0), jnp.transpose(x, (1, 0, 2)))
    hs = jnp.transpose(hs, (1, 0, 2))  # (B, T, H)
    return hs @ w_lin.T + b_lin


if __name__ == "__main__":
    embed_size, hidden_size, vocab_size = 32, 32, 128
    batch, cap_len = 2, 8

    key = jax.random.PRNGKey(0)
    ks = jax.random.split(key, 9)
    scale = 0.1
    params = {
        "embed": scale * jax.random.normal(ks[0], (vocab_size, embed_size), jnp.float32),
        "w_ih": scale * jax.random.normal(ks[1], (4 * hidden_size, embed_size), jnp.float32),
        "w_hh": scale * jax.random.normal(ks[2], (4 * hidden_size, hidden_size), jnp.float32),
        "b_ih": scale * jax.random.normal(ks[3], (4 * hidden_size,), jnp.float32),
        "b_hh": scale * jax.random.normal(ks[4], (4 * hidden_size,), jnp.float32),
        "w_lin": scale * jax.random.normal(ks[5], (vocab_size, hidden_size), jnp.float32),
        "b_lin": scale * jax.random.normal(ks[6], (vocab_size,), jnp.float32),
    }

    features = jax.random.normal(ks[7], (batch, embed_size), jnp.float32)
    captions = jax.random.randint(ks[8], (batch, cap_len), 0, vocab_size, jnp.int32)

    out = decoder_rnn_forward(params, features, captions)
    out = jax.block_until_ready(out)

    ref = _reference_forward(params, features, captions)
    assert out.shape == (batch, cap_len, vocab_size), out.shape
    assert jnp.allclose(out, ref, atol=1e-4, rtol=1e-4), "mismatch vs reference"

    # TODO(synk): sample() (greedy autoregressive decode with data-dependent
    # early stop on predicted_idx == 1) is host-driven control flow; not
    # implemented as a kernel.
    print("KERNEL_OK")
</pallas_src>

<mosaic_0001>
module attributes {stable_mosaic.version = 11 : i64} {
  func.func @_dense_kernel(%arg0: i32, %arg1: i32, %arg2: memref<64x32xf32, #tpu.memory_space<vmem>>, %arg3: memref<32x512xf32, #tpu.memory_space<vmem>>, %arg4: memref<1x512xf32, #tpu.memory_space<vmem>>, %arg5: memref<64x512xf32, #tpu.memory_space<vmem>>) attributes {dimension_semantics = [#tpu.dimension_semantics<parallel>, #tpu.dimension_semantics<parallel>], iteration_bounds = array<i64: 1, 1>, scalar_prefetch = 0 : i64, scratch_operands = 0 : i64, tpu.core_type = #tpu.core_type<tc>, window_params = [{transform_indices = @transform_0, window_bounds = array<i64: 64, 32>}, {transform_indices = @transform_1, window_bounds = array<i64: 32, 512>}, {transform_indices = @transform_2, window_bounds = array<i64: 1, 512>}, {transform_indices = @transform_3, window_bounds = array<i64: 64, 512>}]} {
    %c0 = arith.constant 0 : index
    %c0_0 = arith.constant 0 : index
    %0 = vector.load %arg2[%c0, %c0_0] : memref<64x32xf32, #tpu.memory_space<vmem>>, vector<64x32xf32>
    %c0_1 = arith.constant 0 : index
    %c0_2 = arith.constant 0 : index
    %1 = vector.load %arg3[%c0_1, %c0_2] : memref<32x512xf32, #tpu.memory_space<vmem>>, vector<32x512xf32>
    %cst = arith.constant dense<0.000000e+00> : vector<64x512xf32>
    %2 = tpu.matmul %0, %1, %cst {dimension_numbers = #tpu.dot_dimension_numbers<[1], [0], [0], [1], [0, 0, 1, 1], [], []>} : vector<64x32xf32>, vector<32x512xf32>, vector<64x512xf32> -> vector<64x512xf32>
    %c0_3 = arith.constant 0 : index
    %c0_4 = arith.constant 0 : index
    %3 = vector.load %arg4[%c0_3, %c0_4] : memref<1x512xf32, #tpu.memory_space<vmem>>, vector<1x512xf32>
    %4 = vector.broadcast %3 : vector<1x512xf32> to vector<64x512xf32>
    %5 = arith.addf %2, %4 : vector<64x512xf32>
    %c0_5 = arith.constant 0 : index
    %c0_6 = arith.constant 0 : index
    %6 = vector.load %arg5[%c0_5, %c0_6] : memref<64x512xf32, #tpu.memory_space<vmem>>, vector<64x512xf32>
    tpu.vector_store %arg5[%c0_5, %c0_6], %5 {strides = array<i32>} : memref<64x512xf32, #tpu.memory_space<vmem>>, vector<64x512xf32>,
    return
  }
  func.func @transform_0(%arg0: i32, %arg1: i32) -> (i32, i32) {
    %c0_i32 = arith.constant 0 : i32
    %c0_i32_0 = arith.constant 0 : i32
    return %arg1, %c0_i32 : i32, i32
  }
  func.func @transform_1(%arg0: i32, %arg1: i32) -> (i32, i32) {
    %c0_i32 = arith.constant 0 : i32
    %c0_i32_0 = arith.constant 0 : i32
    return %c0_i32, %arg0 : i32, i32
  }
  func.func @transform_2(%arg0: i32, %arg1: i32) -> (i32, i32) {
    %c0_i32 = arith.constant 0 : i32
    %c0_i32_0 = arith.constant 0 : i32
    return %c0_i32, %arg0 : i32, i32
  }
  func.func @transform_3(%arg0: i32, %arg1: i32) -> (i32, i32) {
    %c0_i32 = arith.constant 0 : i32
    return %arg1, %arg0 : i32, i32
  }
}

</mosaic_0001>

<bundles_post_ra>
// kernel: tpu_custom_call.1
= control target key start
LH: loop header
LB: loop body
LE: loop exit
PB: predicated region body
PF: predicated region fallthrough
CT: control target
= control target key end

     0   :  { %8 = vsyncpa [#allocation3], 0  ;;  %s528_s0 = inlined_call_operand.vmem [shape: f32[64,32], index: 0, kind: input, shape index: {}]   ;;  %s529_s1 = inlined_call_operand.hbm [shape: f32[32,512], index: 1, kind: input, shape index: {}]   ;;  %s530_s2 = inlined_call_operand.vmem [shape: f32[1,512], index: 2, kind: input, shape index: {}]   ;;  %s531_s3 = inlined_call_operand.hbm [shape: f32[64,512], index: 3, kind: output, shape index: {}]  }
   0x1   :  { %9 = vsyncpa [#allocation4], 0  ;;  %s16_s14 = sshll.u32 %s529_s1, 4  ;;  %s393_s15 = smov [#allocation2]   ;;  %s17_s14 = int_to_ptr.hbm [resolvable:$true] %s16_s14 }
   0x2   :  { %s18_s16 = sshll.u32 %s393_s15, 4  ;;  %s394_s17 = smov 512   ;;  %s19_s16 = int_to_ptr.vmem [resolvable:$true] %s18_s16 }
   0x3   :  { %s395_s18 = smov 32  }
   0x4   :  { %24 = dma.hbm_to_vmem [thread:$0]  %s17_s14, 2048, %s19_s16, [#allocation3], %s394_s17, %s394_s17, %s395_s18  }
   0x5   :  { %389 = dma.done.wait [#allocation3], 2048  }
   0x6   :  { %390 = vsyncadd [#allocation3], 4294965248  ;;  %v53_v0 = vld [vmem:[#allocation2 + $0x70] sm:$0xff]  ;;  %v54_v1 = vld [vmem:[#allocation2 + $0x78] sm:$0xff]  ;;  %vm65_vm0 = vcmask 261120   ;;  %s292_s11 = sshll.u32 %s531_s3, 4  ;;  %s293_s11 = int_to_ptr.hbm [resolvable:$true] %s292_s11 }
   0x7   :  { %v49_v2 = vld [vmem:[#allocation2 + $0x50] sm:$0xff]  ;;  %184 = vmatpush.msra.mxu2 %v53_v0  ;;  %225 = vmatpush.msra.mxu3 %v54_v1  ;;  %v50_v3 = vld [vmem:[#allocation2 + $0x58] sm:$0xff]  ;;  %v51_v6 = vld [vmem:[#allocation2 + $0x60] sm:$0xff] }
   0x8   :  { %v45_v4 = vld [vmem:[#allocation2 + $0x30] sm:$0xff]  ;;  %v46_v5 = vld [vmem:[#allocation2 + $0x38] sm:$0xff]  ;;  %v52_v7 = vld [vmem:[#allocation2 + $0x68] sm:$0xff]  ;;  %102 = vmatpush.msra.mxu0 %v51_v6 }
   0x9   :  { %185 = vmatpush.msra.mxu2 %v49_v2  ;;  %226 = vmatpush.msra.mxu3 %v50_v3  ;;  %v47_v8 = vld [vmem:[#allocation2 + $0x40] sm:$0xff]  ;;  %v41_v9 = vld [vmem:[#allocation2 + $0x10] sm:$0xff]  ;;  %v42_v10 = vld [vmem:[#allocation2 + $0x18] sm:$0xff] }
   0xa   :  { %143 = vmatpush.msra.mxu1 %v52_v7  ;;  %v48_v11 = vld [vmem:[#allocation2 + $0x48] sm:$0xff]  ;;  %v31_v12 = vld [vmem:[%s528_s0] sm:$0xff]  ;;  %103 = vmatpush.msra.mxu0 %v47_v8  ;;  %v33_v18 = vld [vmem:[%s528_s0 + $0x10] sm:$0xff] }
   0xb   :  { %186 = vmatpush.msra.mxu2 %v45_v4  ;;  %227 = vmatpush.msra.mxu3 %v46_v5  ;;  %v43_v13 = vld [vmem:[#allocation2 + $0x20] sm:$0xff]  ;;  %v44_v14 = vld [vmem:[#allocation2 + $0x28] sm:$0xff]  ;;  %v34_v19 = vld [vmem:[%s528_s0 + $0x18] sm:$0xff] }
   0xc   :  { %144 = vmatpush.msra.mxu1 %v48_v11  ;;  %v39_v15 = vld [vmem:[#allocation2] sm:$0xff]  ;;  %v40_v16 = vld [vmem:[#allocation2 + $0x8] sm:$0xff]  ;;  %104 = vmatpush.msra.mxu0 %v43_v13  ;;  %v37_v22 = vld [vmem:[%s528_s0 + $0x30] sm:$0xff] }
   0xd   :  { %187 = vmatpush.msra.mxu2 %v41_v9  ;;  %228 = vmatpush.msra.mxu3 %v42_v10  ;;  %v32_v17 = vld [vmem:[%s528_s0 + $0x8] sm:$0xff]  ;;  %v35_v20 = vld [vmem:[%s528_s0 + $0x20] sm:$0xff]  ;;  %v38_v23 = vld [vmem:[%s528_s0 + $0x38] sm:$0xff] }
   0xe   :  { %321 = vmatmul.msk.f32.vlgmr.msra.gmra.mxu2 %vm65_vm0, %v31_v12  ;;  %329 = vmatmul.msk.f32.vlgmr.msra.gmra.mxu3 %vm65_vm0, %v31_v12  ;;  %v36_v21 = vld [vmem:[%s528_s0 + $0x28] sm:$0xff]  ;;  %v55_v24 = vld [vmem:[%s530_s2] sm:$0xf]  ;;  %s396_s0 = smov [#allocation5]  }
   0xf   :  { %145 = vmatpush.msra.mxu1 %v44_v14  ;;  %105 = vmatpush.msra.mxu0 %v39_v15  ;;  %v482_v25 = vperm.slane %v55_v24, 0  ;;  %v484_v26 = vperm.slane %v55_v24, 1  ;;  %v486_v27 = vperm.slane %v55_v24, 2  ;;  %v488_v28 = vperm.slane %v55_v24, 3  ;;  %s290_s2 = sshll.u32 %s396_s0, 4  ;;  %s291_s2 = int_to_ptr.vmem [resolvable:$true] %s290_s2 }
  0x10   :  { %305 = vmatmul.msk.f32.vlgmr.msra.gmra.mxu0 %vm65_vm0, %v31_v12 }
  0x11   :  { %146 = vmatpush.msra.mxu1 %v40_v16 }
  0x12   :  { %313 = vmatmul.msk.f32.vlgmr.msra.gmra.mxu1 %vm65_vm0, %v31_v12 }
  0x16   :  { %322 = vmatmul.msk.f32.gmra.mxu2 %vm65_vm0, %v32_v17  ;;  %330 = vmatmul.msk.f32.gmra.mxu3 %vm65_vm0, %v32_v17 }
  0x18   :  { %306 = vmatmul.msk.f32.gmra.mxu0 %vm65_vm0, %v32_v17 }
  0x1a   :  { %314 = vmatmul.msk.f32.gmra.mxu1 %vm65_vm0, %v32_v17 }
  0x1e   :  { %323 = vmatmul.msk.f32.gmra.mxu2 %vm65_vm0, %v33_v18  ;;  %331 = vmatmul.msk.f32.gmra.mxu3 %vm65_vm0, %v33_v18 }
  0x20   :  { %307 = vmatmul.msk.f32.gmra.mxu0 %vm65_vm0, %v33_v18 }
  0x22   :  { %315 = vmatmul.msk.f32.gmra.mxu1 %vm65_vm0, %v33_v18 }
  0x26   :  { %324 = vmatmul.msk.f32.gmra.mxu2 %vm65_vm0, %v34_v19  ;;  %332 = vmatmul.msk.f32.gmra.mxu3 %vm65_vm0, %v34_v19 }
  0x28   :  { %308 = vmatmul.msk.f32.gmra.mxu0 %vm65_vm0, %v34_v19 }
  0x2a   :  { %316 = vmatmul.msk.f32.gmra.mxu1 %vm65_vm0, %v34_v19 }
  0x2e   :  { %325 = vmatmul.msk.f32.gmra.mxu2 %vm65_vm0, %v35_v20  ;;  %333 = vmatmul.msk.f32.gmra.mxu3 %vm65_vm0, %v35_v20 }
  0x30   :  { %309 = vmatmul.msk.f32.gmra.mxu0 %vm65_vm0, %v35_v20 }
  0x32   :  { %317 = vmatmul.msk.f32.gmra.mxu1 %vm65_vm0, %v35_v20 }
  0x36   :  { %326 = vmatmul.msk.f32.gmra.mxu2 %vm65_vm0, %v36_v21  ;;  %334 = vmatmul.msk.f32.gmra.mxu3 %vm65_vm0, %v36_v21 }
  0x38   :  { %310 = vmatmul.msk.f32.gmra.mxu0 %vm65_vm0, %v36_v21 }
  0x3a   :  { %318 = vmatmul.msk.f32.gmra.mxu1 %vm65_vm0, %v36_v21 }
  0x3e   :  { %327 = vmatmul.msk.f32.gmra.mxu2 %vm65_vm0, %v37_v22  ;;  %335 = vmatmul.msk.f32.gmra.mxu3 %vm65_vm0, %v37_v22 }
  0x40   :  { %311 = vmatmul.msk.f32.gmra.mxu0 %vm65_vm0, %v37_v22 }
  0x42   :  { %319 = vmatmul.msk.f32.gmra.mxu1 %vm65_vm0, %v37_v22 }
  0x46   :  { %328 = vmatmul.msk.f32.gmra.mxu2 %vm65_vm0, %v38_v23  ;;  %336 = vmatmul.msk.f32.gmra.mxu3 %vm65_vm0, %v38_v23 }
  0x48   :  { %312 = vmatmul.msk.f32.gmra.mxu0 %vm65_vm0, %v38_v23 }
  0x4a   :  { %320 = vmatmul.msk.f32.gmra.mxu1 %vm65_vm0, %v38_v23 }
  0x8d   :  { %v107_v29 = vpop.f32.mrf.mxu0 }
  0x8e   :  { %v108_v31 = vadd.f32 %v107_v29, %v482_v25 }
  0x8f   :  { %v148_v30 = vpop.f32.mrf.mxu1 }
  0x90   :  { %v149_v32 = vadd.f32 %v148_v30, %v484_v26  ;;  %254 = vst [vmem:[#allocation5] sm:$0xff] %v108_v31 }
  0x91   :  { %v189_v33 = vpop.f32.mrf.mxu2  ;;  %v230_v34 = vpop.f32.mrf.mxu3 }
  0x92   :  { %v190_v35 = vadd.f32 %v189_v33, %v486_v27  ;;  %v231_v36 = vadd.f32 %v230_v34, %v488_v28  ;;  %255 = vst [vmem:[#allocation5 + $0x8] sm:$0xff] %v149_v32 }
  0x94   :  { %256 = vst [vmem:[#allocation5 + $0x10] sm:$0xff] %v190_v35 }
  0x95   :  { %257 = vst [vmem:[#allocation5 + $0x18] sm:$0xff] %v231_v36  ;;  %v110_v37 = vpop.f32.mrf.mxu0 }
  0x96   :  { %v111_v39 = vadd.f32 %v110_v37, %v482_v25 }
  0x97   :  { %v151_v38 = vpop.f32.mrf.mxu1 }
  0x98   :  { %v152_v40 = vadd.f32 %v151_v38, %v484_v26  ;;  %258 = vst [vmem:[#allocation5 + $0x20] sm:$0xff] %v111_v39 }
  0x99   :  { %v192_v41 = vpop.f32.mrf.mxu2  ;;  %v233_v42 = vpop.f32.mrf.mxu3 }
  0x9a   :  { %v193_v43 = vadd.f32 %v192_v41, %v486_v27  ;;  %v234_v44 = vadd.f32 %v233_v42, %v488_v28  ;;  %259 = vst [vmem:[#allocation5 + $0x28] sm:$0xff] %v152_v40 }
  0x9c   :  { %260 = vst [vmem:[#allocation5 + $0x30] sm:$0xff] %v193_v43 }
  0x9d   :  { %261 = vst [vmem:[#allocation5 + $0x38] sm:$0xff] %v234_v44  ;;  %v113_v45 = vpop.f32.mrf.mxu0 }
  0x9e   :  { %v114_v47 = vadd.f32 %v113_v45, %v482_v25 }
  0x9f   :  { %v154_v46 = vpop.f32.mrf.mxu1 }
  0xa0   :  { %v155_v48 = vadd.f32 %v154_v46, %v484_v26  ;;  %262 = vst [vmem:[#allocation5 + $0x40] sm:$0xff] %v114_v47 }
  0xa1   :  { %v195_v49 = vpop.f32.mrf.mxu2  ;;  %v236_v50 = vpop.f32.mrf.mxu3 }
  0xa2   :  { %v196_v51 = vadd.f32 %v195_v49, %v486_v27  ;;  %v237_v52 = vadd.f32 %v236_v50, %v488_v28  ;;  %263 = vst [vmem:[#allocation5 + $0x48] sm:$0xff] %v155_v48 }
  0xa4   :  { %264 = vst [vmem:[#allocation5 + $0x50] sm:$0xff] %v196_v51 }
  0xa5   :  { %265 = vst [vmem:[#allocation5 + $0x58] sm:$0xff] %v237_v52  ;;  %v116_v53 = vpop.f32.mrf.mxu0 }
  0xa6   :  { %v117_v55 = vadd.f32 %v116_v53, %v482_v25 }
  0xa7   :  { %v157_v54 = vpop.f32.mrf.mxu1 }
  0xa8   :  { %v158_v56 = vadd.f32 %v157_v54, %v484_v26  ;;  %266 = vst [vmem:[#allocation5 + $0x60] sm:$0xff] %v117_v55 }
  0xa9   :  { %v198_v57 = vpop.f32.mrf.mxu2  ;;  %v239_v58 = vpop.f32.mrf.mxu3 }
  0xaa   :  { %v199_v59 = vadd.f32 %v198_v57, %v486_v27  ;;  %v240_v60 = vadd.f32 %v239_v58, %v488_v28  ;;  %267 = vst [vmem:[#allocation5 + $0x68] sm:$0xff] %v158_v56 }
  0xac   :  { %268 = vst [vmem:[#allocation5 + $0x70] sm:$0xff] %v199_v59 }
  0xad   :  { %269 = vst [vmem:[#allocation5 + $0x78] sm:$0xff] %v240_v60  ;;  %v119_v61 = vpop.f32.mrf.mxu0 }
  0xae   :  { %v120_v63 = vadd.f32 %v119_v61, %v482_v25 }
  0xaf   :  { %v160_v62 = vpop.f32.mrf.mxu1 }
  0xb0   :  { %v161_v0 = vadd.f32 %v160_v62, %v484_v26  ;;  %270 = vst [vmem:[#allocation5 + $0x80] sm:$0xff] %v120_v63 }
  0xb1   :  { %v201_v1 = vpop.f32.mrf.mxu2  ;;  %v242_v2 = vpop.f32.mrf.mxu3 }
  0xb2   :  { %v202_v3 = vadd.f32 %v201_v1, %v486_v27  ;;  %v243_v4 = vadd.f32 %v242_v2, %v488_v28  ;;  %271 = vst [vmem:[#allocation5 + $0x88] sm:$0xff] %v161_v0 }
  0xb4   :  { %272 = vst [vmem:[#allocation5 + $0x90] sm:$0xff] %v202_v3 }
  0xb5   :  { %273 = vst [vmem:[#allocation5 + $0x98] sm:$0xff] %v243_v4  ;;  %v122_v5 = vpop.f32.mrf.mxu0 }
  0xb6   :  { %v123_v7 = vadd.f32 %v122_v5, %v482_v25 }
  0xb7   :  { %v163_v6 = vpop.f32.mrf.mxu1 }
  0xb8   :  { %v164_v8 = vadd.f32 %v163_v6, %v484_v26  ;;  %274 = vst [vmem:[#allocation5 + $0xa0] sm:$0xff] %v123_v7 }
  0xb9   :  { %v204_v9 = vpop.f32.mrf.mxu2  ;;  %v245_v10 = vpop.f32.mrf.mxu3 }
  0xba   :  { %v205_v11 = vadd.f32 %v204_v9, %v486_v27  ;;  %v246_v12 = vadd.f32 %v245_v10, %v488_v28  ;;  %275 = vst [vmem:[#allocation5 + $0xa8] sm:$0xff] %v164_v8 }
  0xbc   :  { %276 = vst [vmem:[#allocation5 + $0xb0] sm:$0xff] %v205_v11 }
  0xbd   :  { %277 = vst [vmem:[#allocation5 + $0xb8] sm:$0xff] %v246_v12  ;;  %v125_v13 = vpop.f32.mrf.mxu0 }
  0xbe   :  { %v126_v15 = vadd.f32 %v125_v13, %v482_v25 }
  0xbf   :  { %v166_v14 = vpop.f32.mrf.mxu1 }
  0xc0   :  { %v167_v16 = vadd.f32 %v166_v14, %v484_v26  ;;  %278 = vst [vmem:[#allocation5 + $0xc0] sm:$0xff] %v126_v15 }
  0xc1   :  { %v207_v17 = vpop.f32.mrf.mxu2  ;;  %v248_v18 = vpop.f32.mrf.mxu3 }
  0xc2   :  { %v208_v19 = vadd.f32 %v207_v17, %v486_v27  ;;  %v249_v20 = vadd.f32 %v248_v18, %v488_v28  ;;  %279 = vst [vmem:[#allocation5 + $0xc8] sm:$0xff] %v167_v16 }
  0xc4   :  { %280 = vst [vmem:[#allocation5 + $0xd0] sm:$0xff] %v208_v19 }
  0xc5   :  { %281 = vst [vmem:[#allocation5 + $0xd8] sm:$0xff] %v249_v20  ;;  %v128_v21 = vpop.f32.mrf.mxu0 }
  0xc6   :  { %v129_v23 = vadd.f32 %v128_v21, %v482_v25 }
  0xc7   :  { %v169_v22 = vpop.f32.mrf.mxu1 }
  0xc8   :  { %v170_v24 = vadd.f32 %v169_v22, %v484_v26  ;;  %282 = vst [vmem:[#allocation5 + $0xe0] sm:$0xff] %v129_v23 }
  0xc9   :  { %v210_v29 = vpop.f32.mrf.mxu2  ;;  %v251_v30 = vpop.f32.mrf.mxu3 }
  0xca   :  { %v211_v31 = vadd.f32 %v210_v29, %v486_v27  ;;  %v252_v32 = vadd.f32 %v251_v30, %v488_v28  ;;  %283 = vst [vmem:[#allocation5 + $0xe8] sm:$0xff] %v170_v24 }
  0xcc   :  { %284 = vst [vmem:[#allocation5 + $0xf0] sm:$0xff] %v211_v31 }
  0xcd   :  { %285 = vst [vmem:[#allocation5 + $0xf8] sm:$0xff] %v252_v32 }
  0xce   :  { %298 = dma.vmem_to_hbm [thread:$0]  %s291_s2, 4096, %s293_s11, [#allocation4], %s394_s17, %s394_s17, %s395_s18  }
  0xcf   :  { %391 = dma.done.wait [#allocation4], 4096  }
  0xd0   :  { %392 = vsyncadd [#allocation4], 4294963200 }
  0xd1   :  { %303 = vsyncpa [#allocation3], 1 }
  0xd2   :  { %304 = vsyncpa [#allocation4], 1 }

</bundles_post_ra>
